<compile_context>
chip_gen: v7x
topology: tpu7x:2x2x1
jax: 0.10.0
libtpu: 0.0.40
codegen_flags: <defaults>
</compile_context>

<pallas_src>
import jax
import jax.numpy as jnp
from jax.experimental import pallas as pl
from jax.experimental.pallas import tpu as pltpu

_LANE_TILE = 256  # MXU width on v6e/v7x (a multiple of v5e's 128)


def _cdiv(a, b):
    return -(-a // b)


def _round_up(x, m):
    return ((x + m - 1) // m) * m


def _make_critic_kernel(num_layers, compute_dtype):
    """Feature-major MLP over one batch tile.

    refs = (x_t, w1_t, b1, w2_t, b2, ..., wL_t, bL, out)
      x_t   : (F, tile_b)      compute_dtype   (batch on lanes)
      wi_t  : (h_out, h_in)    compute_dtype   (transposed Linear weight)
      bi    : (h_out, 1)       float32
      out   : (1, tile_b)      float32         (lane-dense store)
    """

    def kernel(*refs):
        x_ref = refs[0]
        out_ref = refs[-1]
        param_refs = refs[1:-1]

        x = x_ref[...]                              # (F, tile_b)
        for i in range(num_layers):
            w_t = param_refs[2 * i][...]            # (h_out, h_in)
            b = param_refs[2 * i + 1][...]          # (h_out, 1), f32
            # MXU matmul with f32 accumulator; bias broadcast along lanes.
            y = jnp.dot(w_t, x, preferred_element_type=jnp.float32) + b
            if i < num_layers - 1:
                y = jnp.maximum(y, 0.0)             # ReLU in f32 (v5e-safe)
                x = y.astype(compute_dtype)         # back to MXU operand dtype
            else:
                out_ref[...] = y.astype(out_ref.dtype)   # (1, tile_b)

    return kernel


def critic_forward(state, action, params, *, tile_b_max=2048,
                   compute_dtype=jnp.bfloat16):
    """state: (B, num_states), action: (B, num_actions).

    params: list of (W, b) per Linear layer, W of shape (in_features, out_features).
    Returns jnp.squeeze(mlp(concat([state, action], 1))) — matches the PyTorch
    module (including the B == 1 -> scalar squeeze behaviour).
    """
    batch, num_states = state.shape
    _, num_actions = action.shape
    feat = num_states + num_actions
    num_layers = len(params)

    # ---- balanced batch tiling (batch is the lane axis) --------------------
    n_tiles = max(1, _cdiv(batch, tile_b_max))
    if n_tiles == 1 and batch > _LANE_TILE:
        n_tiles = 2                         # >= 2 grid steps -> both v7x TCs
    tile_b = _round_up(_cdiv(batch, n_tiles), _LANE_TILE)
    padded_b = n_tiles * tile_b

    # ---- concat + cast + transpose in one fused XLA pass --------------------
    x_t = jnp.concatenate([state, action], axis=1).astype(compute_dtype).T  # (F, B)
    if padded_b != batch:
        x_t = jnp.pad(x_t, ((0, 0), (0, padded_b - batch)))

    # ---- transposed params: W^T in compute dtype, f32 column biases ---------
    flat_params = []
    for w, b in params:
        flat_params.append(jnp.asarray(w).T.astype(compute_dtype))            # (h_out, h_in)
        flat_params.append(jnp.asarray(b).reshape(-1, 1).astype(jnp.float32))  # (h_out, 1)

    # ---- specs --------------------------------------------------------------
    in_specs = [pl.BlockSpec((feat, tile_b), lambda i: (0, i))]
    for p in flat_params:
        # Constant block index -> fetched once, VMEM-resident across the grid.
        in_specs.append(pl.BlockSpec(p.shape, lambda i: (0, 0)))
    out_spec = pl.BlockSpec((1, tile_b), lambda i: (0, i))       # lane-dense

    # ---- cost estimate (advisory) -------------------------------------------
    dims = [feat] + [w.shape[1] for (w, _) in params]
    flops = 2 * batch * sum(dims[i] * dims[i + 1] for i in range(len(dims) - 1))
    bytes_accessed = (
        x_t.size * x_t.dtype.itemsize
        + sum(p.size * p.dtype.itemsize for p in flat_params)
        + padded_b * 4
    )
    cost = pl.CostEstimate(flops=flops, transcendentals=0,
                           bytes_accessed=bytes_accessed)

    out = pl.pallas_call(
        _make_critic_kernel(num_layers, compute_dtype),
        out_shape=jax.ShapeDtypeStruct((1, padded_b), jnp.float32),
        grid=(n_tiles,),
        in_specs=in_specs,
        out_specs=out_spec,
        compiler_params=pltpu.CompilerParams(
            dimension_semantics=("parallel",)),   # megacore sharding on v7x
        cost_estimate=cost,
    )(x_t, *flat_params)

    # Padded columns hold bias-propagated garbage -> sliced off here.
    # Matches torch .squeeze(): (B,) for B > 1, scalar for B == 1.
    return jnp.squeeze(out[0, :batch])


def init_mlp_params(key, in_dim, hidden_dims, out_dim):
    """Deterministic init mirroring nn.Linear default (uniform +/- 1/sqrt(fan_in))."""
    dims = [in_dim] + list(hidden_dims) + [out_dim]
    params = []
    for i in range(len(dims) - 1):
        key, wk, bk = jax.random.split(key, 3)
        bound = 1.0 / (dims[i] ** 0.5)
        w = jax.random.uniform(wk, (dims[i], dims[i + 1]), jnp.float32, -bound, bound)
        b = jax.random.uniform(bk, (dims[i + 1],), jnp.float32, -bound, bound)
        params.append((w, b))
    return params


def _reference_forward(state, action, params):
    """Pure-JAX f32 reference of the PyTorch forward pass."""
    x = jnp.concatenate([state, action], axis=1)
    for i, (w, b) in enumerate(params):
        x = x @ w + b
        if i < len(params) - 1:
            x = jnp.maximum(x, 0.0)
    return jnp.squeeze(x)


if __name__ == "__main__":
    # Small shapes consistent with the module.
    batch = 8
    num_states = 16
    num_actions = 8
    hidden_dims = [32, 32]

    key = jax.random.PRNGKey(0)
    k_state, k_action, k_params = jax.random.split(key, 3)

    state = jax.random.normal(k_state, (batch, num_states), jnp.float32)
    action = jax.random.normal(k_action, (batch, num_actions), jnp.float32)
    params = init_mlp_params(k_params, num_states + num_actions, hidden_dims, 1)
    ref = _reference_forward(state, action, params)

    # 1) f32 path — tight semantics check.
    out_f32 = critic_forward(state, action, params, compute_dtype=jnp.float32)
    out_f32 = jax.block_until_ready(out_f32)
    assert out_f32.shape == (batch,)
    assert jnp.allclose(out_f32, ref, atol=1e-3, rtol=1e-3)

    # 2) Default bf16 MXU-operand path (HBM / vreg win) — loose check.
    out_bf16 = critic_forward(state, action, params)   # compute_dtype=bf16 default
    out_bf16 = jax.block_until_ready(out_bf16)
    assert out_bf16.shape == (batch,)
    assert jnp.allclose(out_bf16, ref, atol=5e-2, rtol=5e-2)

    # 3) Multi-tile grid + balanced ragged-batch padding path.
    b2 = 1000  # not a multiple of the lane tile -> exercises padding + grid > 1
    k_s2, k_a2 = jax.random.split(jax.random.PRNGKey(1))
    state2 = jax.random.normal(k_s2, (b2, num_states), jnp.float32)
    action2 = jax.random.normal(k_a2, (b2, num_actions), jnp.float32)
    ref2 = _reference_forward(state2, action2, params)
    out2 = critic_forward(state2, action2, params, tile_b_max=256,
                          compute_dtype=jnp.float32)
    out2 = jax.block_until_ready(out2)
    assert out2.shape == (b2,)
    assert jnp.allclose(out2, ref2, atol=1e-3, rtol=1e-3)

    print("KERNEL_OK")
</pallas_src>

<mosaic_0001>
module attributes {stable_mosaic.version = 11 : i64} {
  func.func @kernel(%arg0: i32, %arg1: memref<24x256xf32, #tpu.memory_space<vmem>>, %arg2: memref<32x24xf32, #tpu.memory_space<vmem>>, %arg3: memref<32x1xf32, #tpu.memory_space<vmem>>, %arg4: memref<32x32xf32, #tpu.memory_space<vmem>>, %arg5: memref<32x1xf32, #tpu.memory_space<vmem>>, %arg6: memref<1x32xf32, #tpu.memory_space<vmem>>, %arg7: memref<1x1xf32, #tpu.memory_space<vmem>>, %arg8: memref<1x256xf32, #tpu.memory_space<vmem>>) attributes {dimension_semantics = [#tpu.dimension_semantics<parallel>], iteration_bounds = array<i64: 1>, scalar_prefetch = 0 : i64, scratch_operands = 0 : i64, tpu.core_type = #tpu.core_type<tc>, window_params = [{transform_indices = @transform_0, window_bounds = array<i64: 24, 256>}, {pipeline_mode = #tpu.pipeline_mode<synchronous>, transform_indices = @transform_1, window_bounds = array<i64: 32, 24>}, {pipeline_mode = #tpu.pipeline_mode<synchronous>, transform_indices = @transform_2, window_bounds = array<i64: 32, 1>}, {pipeline_mode = #tpu.pipeline_mode<synchronous>, transform_indices = @transform_3, window_bounds = array<i64: 32, 32>}, {pipeline_mode = #tpu.pipeline_mode<synchronous>, transform_indices = @transform_4, window_bounds = array<i64: 32, 1>}, {pipeline_mode = #tpu.pipeline_mode<synchronous>, transform_indices = @transform_5, window_bounds = array<i64: 1, 32>}, {pipeline_mode = #tpu.pipeline_mode<synchronous>, transform_indices = @transform_6, window_bounds = array<i64: 1, 1>}, {transform_indices = @transform_7, window_bounds = array<i64: 1, 256>}]} {
    %c0 = arith.constant 0 : index
    %c0_0 = arith.constant 0 : index
    %0 = vector.load %arg1[%c0, %c0_0] : memref<24x256xf32, #tpu.memory_space<vmem>>, vector<24x256xf32>
    %c0_1 = arith.constant 0 : index
    %c0_2 = arith.constant 0 : index
    %1 = vector.load %arg2[%c0_1, %c0_2] : memref<32x24xf32, #tpu.memory_space<vmem>>, vector<32x24xf32>
    %c0_3 = arith.constant 0 : index
    %c0_4 = arith.constant 0 : index
    %2 = vector.load %arg3[%c0_3, %c0_4] : memref<32x1xf32, #tpu.memory_space<vmem>>, vector<32x1xf32>
    %cst = arith.constant dense<0.000000e+00> : vector<32x256xf32>
    %3 = tpu.matmul %1, %0, %cst {dimension_numbers = #tpu.dot_dimension_numbers<[1], [0], [0], [1], [0, 0, 1, 1], [], []>} : vector<32x24xf32>, vector<24x256xf32>, vector<32x256xf32> -> vector<32x256xf32>
    %4 = vector.broadcast %2 : vector<32x1xf32> to vector<32x256xf32>
    %5 = arith.addf %3, %4 : vector<32x256xf32>
    %cst_5 = arith.constant 0.000000e+00 : f32
    %6 = vector.broadcast %cst_5 : f32 to vector<32x256xf32>
    %7 = arith.maximumf %5, %6 : vector<32x256xf32>
    %c0_6 = arith.constant 0 : index
    %c0_7 = arith.constant 0 : index
    %8 = vector.load %arg4[%c0_6, %c0_7] : memref<32x32xf32, #tpu.memory_space<vmem>>, vector<32x32xf32>
    %c0_8 = arith.constant 0 : index
    %c0_9 = arith.constant 0 : index
    %9 = vector.load %arg5[%c0_8, %c0_9] : memref<32x1xf32, #tpu.memory_space<vmem>>, vector<32x1xf32>
    %cst_10 = arith.constant dense<0.000000e+00> : vector<32x256xf32>
    %10 = tpu.matmul %8, %7, %cst_10 {dimension_numbers = #tpu.dot_dimension_numbers<[1], [0], [0], [1], [0, 0, 1, 1], [], []>} : vector<32x32xf32>, vector<32x256xf32>, vector<32x256xf32> -> vector<32x256xf32>
    %11 = vector.broadcast %9 : vector<32x1xf32> to vector<32x256xf32>
    %12 = arith.addf %10, %11 : vector<32x256xf32>
    %cst_11 = arith.constant 0.000000e+00 : f32
    %13 = vector.broadcast %cst_11 : f32 to vector<32x256xf32>
    %14 = arith.maximumf %12, %13 : vector<32x256xf32>
    %c0_12 = arith.constant 0 : index
    %c0_13 = arith.constant 0 : index
    %15 = vector.load %arg6[%c0_12, %c0_13] : memref<1x32xf32, #tpu.memory_space<vmem>>, vector<1x32xf32>
    %c0_14 = arith.constant 0 : index
    %c0_15 = arith.constant 0 : index
    %16 = vector.load %arg7[%c0_14, %c0_15] : memref<1x1xf32, #tpu.memory_space<vmem>>, vector<1x1xf32>
    %cst_16 = arith.constant dense<0.000000e+00> : vector<1x256xf32>
    %17 = tpu.matmul %15, %14, %cst_16 {dimension_numbers = #tpu.dot_dimension_numbers<[1], [0], [0], [1], [0, 0, 1, 1], [], []>} : vector<1x32xf32>, vector<32x256xf32>, vector<1x256xf32> -> vector<1x256xf32>
    %18 = vector.broadcast %16 : vector<1x1xf32> to vector<1x256xf32>
    %19 = arith.addf %17, %18 : vector<1x256xf32>
    %c0_17 = arith.constant 0 : index
    %c0_18 = arith.constant 0 : index
    %20 = vector.load %arg8[%c0_17, %c0_18] : memref<1x256xf32, #tpu.memory_space<vmem>>, vector<1x256xf32>
    tpu.vector_store %arg8[%c0_17, %c0_18], %19 {strides = array<i32>} : memref<1x256xf32, #tpu.memory_space<vmem>>, vector<1x256xf32>,
    return
  }
  func.func @transform_0(%arg0: i32) -> (i32, i32) {
    %c0_i32 = arith.constant 0 : i32
    %c0_i32_0 = arith.constant 0 : i32
    return %c0_i32, %arg0 : i32, i32
  }
  func.func @transform_1(%arg0: i32) -> (i32, i32) {
    %c0_i32 = arith.constant 0 : i32
    %c0_i32_0 = arith.constant 0 : i32
    %c0_i32_1 = arith.constant 0 : i32
    return %c0_i32, %c0_i32_0 : i32, i32
  }
  func.func @transform_2(%arg0: i32) -> (i32, i32) {
    %c0_i32 = arith.constant 0 : i32
    %c0_i32_0 = arith.constant 0 : i32
    %c0_i32_1 = arith.constant 0 : i32
    return %c0_i32, %c0_i32_0 : i32, i32
  }
  func.func @transform_3(%arg0: i32) -> (i32, i32) {
    %c0_i32 = arith.constant 0 : i32
    %c0_i32_0 = arith.constant 0 : i32
    %c0_i32_1 = arith.constant 0 : i32
    return %c0_i32, %c0_i32_0 : i32, i32
  }
  func.func @transform_4(%arg0: i32) -> (i32, i32) {
    %c0_i32 = arith.constant 0 : i32
    %c0_i32_0 = arith.constant 0 : i32
    %c0_i32_1 = arith.constant 0 : i32
    return %c0_i32, %c0_i32_0 : i32, i32
  }
  func.func @transform_5(%arg0: i32) -> (i32, i32) {
    %c0_i32 = arith.constant 0 : i32
    %c0_i32_0 = arith.constant 0 : i32
    %c0_i32_1 = arith.constant 0 : i32
    return %c0_i32, %c0_i32_0 : i32, i32
  }
  func.func @transform_6(%arg0: i32) -> (i32, i32) {
    %c0_i32 = arith.constant 0 : i32
    %c0_i32_0 = arith.constant 0 : i32
    %c0_i32_1 = arith.constant 0 : i32
    return %c0_i32, %c0_i32_0 : i32, i32
  }
  func.func @transform_7(%arg0: i32) -> (i32, i32) {
    %c0_i32 = arith.constant 0 : i32
    %c0_i32_0 = arith.constant 0 : i32
    return %c0_i32, %arg0 : i32, i32
  }
}

</mosaic_0001>

<bundles_post_ra>
// kernel: tpu_custom_call.1
= control target key start
LH: loop header
LB: loop body
LE: loop exit
PB: predicated region body
PF: predicated region fallthrough
CT: control target
= control target key end

     0   :  { %s638_s0 = inlined_call_operand.vmem [shape: f32[24,256], index: 0, kind: input, shape index: {}]   ;;  %s639_s1 = inlined_call_operand.vmem [shape: f32[32,24], index: 1, kind: input, shape index: {}]   ;;  %s640_s2 = inlined_call_operand.vmem [shape: f32[32,1], index: 2, kind: input, shape index: {}]   ;;  %s641_s3 = inlined_call_operand.vmem [shape: f32[32,32], index: 3, kind: input, shape index: {}]   ;;  %s642_s4 = inlined_call_operand.vmem [shape: f32[32,1], index: 4, kind: input, shape index: {}]   ;;  %s643_s5 = inlined_call_operand.vmem [shape: f32[1,32], index: 5, kind: input, shape index: {}]   ;;  %s644_s6 = inlined_call_operand.<no memory space> [shape: f32[1,1], index: 6, kind: input, shape index: {}]   ;;  %s645_s7 = inlined_call_operand.hbm [shape: f32[1,256], index: 7, kind: output, shape index: {}]  }
   0x1   :  { %v12_v0 = vstv %s644_s6 }
   0x2   :  { %13 = vst [vmem:[#allocation2] sm:$0x1] %v12_v0 }
   0x3   :  { %v30_v1 = vld [vmem:[%s638_s0 + $0x8] sm:$0xff]  ;;  %v32_v2 = vld [vmem:[%s638_s0 + $0x18] sm:$0xff]  ;;  %v29_v3 = vld [vmem:[%s638_s0] sm:$0xff]  ;;  %v492_v6 = vmov 0.0   ;;  %v493_v7 = vmov 0   ;;  %vm63_vm0 = vcmask 195584  }
   0x4   :  { %v442_v4 = vpack.c.bf16 %v32_v2, %v30_v1  ;;  %v31_v5 = vld [vmem:[%s638_s0 + $0x10] sm:$0xff]  ;;  %140 = vmatprep.mubr.f32.mxu0 %v492_v6  ;;  %466 = vset.pattern.permute.xlu0 %v493_v7  ;;  %v34_v9 = vld [vmem:[%s638_s0 + $0x28] sm:$0xff]  ;;  %v39_v10 = vld [vmem:[%s640_s2] sm:$0xff] }
   0x5   :  { %v444_v8 = vpack.c.bf16 %v31_v5, %v29_v3  ;;  %467 = vset.pattern.permute.xlu1 %v493_v7  ;;  %278 = vmatprep.mubr.f32.mxu1 %v492_v6  ;;  %v41_v11 = vld [vmem:[%s640_s2 + $0x10] sm:$0xff]  ;;  %v33_v12 = vld [vmem:[%s638_s0 + $0x20] sm:$0xff]  ;;  %v40_v13 = vld [vmem:[%s640_s2 + $0x8] sm:$0xff] }
   0x6   :  { %443 = vmatprep.subr.bf16.mxu0 %v442_v4  ;;  %45 = vperm.xlu0 %466, %v39_v10   ;;  %v35_v14 = vld [vmem:[%s639_s1] sm:$0xff]  ;;  %v42_v15 = vld [vmem:[%s640_s2 + $0x18] sm:$0xff] }
   0x7   :  { %445 = vmatpush1.bf16.msra.mxu0 %v444_v8  ;;  %55 = vperm.xlu1 %467, %v41_v11  }
   0x8   :  { %80 = vmatprep.subr.mxu0 %v34_v9 }
   0x9   :  { %14 = vsyncpa [#allocation4], 0  ;;  %v177_v16 = vld [vmem:[%s642_s4] sm:$0xff]  ;;  %v36_v17 = vld [vmem:[%s639_s1 + $0x8] sm:$0xff]  ;;  %vm201_vm1 = vcmask 261120   ;;  %s495_s19 = smov [#allocation3]  }
   0xa   :  { %50 = vperm.xlu0 %466, %v40_v13   ;;  %v178_v18 = vld [vmem:[%s642_s4 + $0x8] sm:$0xff]  ;;  %v179_v19 = vld [vmem:[%s642_s4 + $0x10] sm:$0xff]  ;;  %v180_v21 = vld [vmem:[%s642_s4 + $0x18] sm:$0xff]  ;;  %s425_s20 = sshll.u32 %s495_s19, 4  ;;  %s426_s20 = int_to_ptr.vmem [resolvable:$true] %s425_s20 }
   0xb   :  { %81 = vmatpush1.msra.mxu0 %v33_v12  ;;  %60 = vperm.xlu1 %467, %v42_v15   ;;  %v37_v20 = vld [vmem:[%s639_s1 + $0x10] sm:$0xff]  ;;  %v312_v22 = vld [vmem:[#allocation2] sm:$0x1]  ;;  %v38_v23 = vld [vmem:[%s639_s1 + $0x18] sm:$0xff]  ;;  %p473_p1 = scmp.lt.s32.totalorder %s426_s20, %s426_s20 }
   0xc   :  { %433 = vmatmul.mubr.msk.f32.vlgmr.msra.gmra.mrb[0].mxu0 %vm63_vm0, %v35_v14  ;;  %v173_v56 = vld [vmem:[%s641_s3] sm:$0xff]  ;;  %v174_v57 = vld [vmem:[%s641_s3 + $0x8] sm:$0xff]  ;;  %v175_v58 = vld [vmem:[%s641_s3 + $0x10] sm:$0xff] }
   0xd   :  { %146 = vmatprep.mubr.f32.mxu0 %v492_v6  ;;  %v176_v59 = vld [vmem:[%s641_s3 + $0x18] sm:$0xff] }
   0xe   :  { %183 = vperm.xlu0 %466, %v177_v16  }
   0xf   :  { %188 = vperm.xlu1 %467, %v178_v18  }
  0x10   :  { %434 = vmatmul.mubr.msk.f32.gmra.mrb[2].mxu0 %vm63_vm0, %v36_v17 }
  0x11   :  { %152 = vmatprep.mubr.f32.mxu0 %v492_v6 }
  0x12   :  { %193 = vperm.xlu0 %466, %v179_v19  }
  0x13   :  { %198 = vperm.xlu1 %467, %v180_v21  }
  0x14   :  { %435 = vmatmul.mubr.msk.f32.gmra.mrb[4].mxu0 %vm63_vm0, %v37_v20 }
  0x15   :  { %158 = vmatprep.mubr.f32.mxu0 %v492_v6 }
  0x16   :  { %315 = vperm.xlu0 %466, %v312_v22  }
  0x18   :  { %436 = vmatmul.mubr.msk.f32.gmra.mrb[6].mxu0 %vm63_vm0, %v38_v23 }
  0x19   :  { %389 = vmatprep.mubr.f32.mxu0 %v492_v6 }
  0x85   :  { %v46_v24 = vpop.permute.xlu0 %45 }
  0x86   :  { %v56_v33 = vpop.permute.xlu1 %55 }
  0x89   :  { %v51_v28 = vpop.permute.xlu0 %50 }
  0x8a   :  { %v61_v44 = vpop.permute.xlu1 %60 }
  0x8d   :  { %v184_v62 = vpop.permute.xlu0 %183 }
  0x8e   :  { %v189_v0 = vpop.permute.xlu1 %188 }
  0x91   :  { %v194_v13 = vpop.permute.xlu0 %193 }
  0x92   :  { %v199_v16 = vpop.permute.xlu1 %198 }
  0xdf   :  { %v142_v25 = vpop.f32.mrb[0].mxu0 }
  0xe0   :  { %v144_v26 = vpop.f32.mrb[1].mxu0  ;;  %v143_v27 = vadd.f32 %v142_v25, %v46_v24 }
  0xe1   :  { %v145_v29 = vadd.f32 %v144_v26, %v46_v24 }
  0xe2   :  { %v165_v35 = vmax.f32 %v143_v27, 0.0 }
  0xe3   :  { %v148_v30 = vpop.f32.mrb[2].mxu0  ;;  %v166_v37 = vmax.f32 %v145_v29, 0.0  ;;  %v318_v29 = vlaneseq }
  0xe4   :  { %v149_v31 = vadd.f32 %v148_v30, %v51_v28  ;;  %v150_v32 = vpop.f32.mrb[3].mxu0 }
  0xe5   :  { %v151_v34 = vadd.f32 %v150_v32, %v51_v28  ;;  %v311_v28 = vld [vmem:[%s643_s5] sm:$0x1]  ;;  %v319_v30 = vshrl.u32 %v318_v29, 7  ;;  %vm416_vm2 = vcmp.lt.s32.totalorder %v318_v29, 256  ;;  %s468_s5 = scalar_lea.vmem %s426_s20, 32 }
  0xe6   :  { %v167_v36 = vmax.f32 %v149_v31, 0.0  ;;  %v494_v31 = vmov 1966171168   ;;  %p469_p0 = scmp.ne.s32.totalorder %s426_s20, %s468_s5  ;;  %p474_p2 = scmp.lt.s32.totalorder %s468_s5, %s468_s5 }
  0xe7   :  { %v168_v38 = vmax.f32 %v151_v34, 0.0  ;;  %v154_v39 = vpop.f32.mrb[4].mxu0  ;;  %v400_v32 = vunpack.c.l.s4 %v494_v31  ;;  %v316_v34 = vpop.permute.xlu0 %315 }
  0xe8   :  { %v156_v40 = vpop.f32.mrb[5].mxu0  ;;  %v448_v41 = vpack.c.bf16 %v167_v36, %v165_v35  ;;  %v155_v43 = vadd.f32 %v154_v39, %v56_v33  ;;  %p475_p3 = por %p474_p2, %p473_p1 }
  0xe9   :  { %v446_v42 = vpack.c.bf16 %v168_v38, %v166_v37  ;;  %v157_v45 = vadd.f32 %v156_v40, %v56_v33  ;;  %v320_v33 = vsub.s32 0, %v319_v30  ;;  %v401_v35 = vunpack.c.0.s8 %v400_v32 }
  0xea   :  { %v169_v50 = vmax.f32 %v155_v43, 0.0  ;;  %p476_p4 = pnand %p475_p3, %p469_p0 }
  0xeb   :  { %v160_v46 = vpop.f32.mrb[6].mxu0  ;;  %447 = vmatprep.subr.bf16.mxu1 %v446_v42  ;;  %v170_v52 = vmax.f32 %v157_v45, 0.0  ;;  %v321_v36 = vrot.slane %v316_v34, %v320_v33 }
  0xec   :  { %v161_v47 = vadd.f32 %v160_v46, %v61_v44  ;;  %v162_v48 = vpop.f32.mrb[7].mxu0  ;;  %449 = vmatpush1.bf16.msra.mxu1 %v448_v41  ;;  %v404_v41 = vsub.s32 %v401_v35, %v319_v30 }
  0xed   :  { %v163_v49 = vadd.f32 %v162_v48, %v61_v44 }
  0xee   :  { %v171_v51 = vmax.f32 %v161_v47, 0.0 }
  0xef   :  { %v172_v53 = vmax.f32 %v163_v49, 0.0 }
  0xf0   :  { %v452_v54 = vpack.c.bf16 %v171_v51, %v169_v50 }
  0xf1   :  { %v450_v55 = vpack.c.bf16 %v172_v53, %v170_v52 }
  0xf3   :  { %451 = vmatprep.subr.bf16.mxu1 %v450_v55 }
  0xf4   :  { %453 = vmatpush1.bf16.msra.mxu1 %v452_v54 }
  0xf7   :  { %437 = vmatmul.mubr.msk.f32.vlgmr.msra.gmra.mrb[0].mxu1 %vm201_vm1, %v173_v56 }
  0xf8   :  { %284 = vmatprep.mubr.f32.mxu1 %v492_v6 }
  0xfb   :  { %438 = vmatmul.mubr.msk.f32.gmra.mrb[2].mxu1 %vm201_vm1, %v174_v57 }
  0xfc   :  { %290 = vmatprep.mubr.f32.mxu1 %v492_v6 }
  0xff   :  { %439 = vmatmul.mubr.msk.f32.gmra.mrb[4].mxu1 %vm201_vm1, %v175_v58 }
 0x100   :  { %296 = vmatprep.mubr.f32.mxu1 %v492_v6 }
 0x103   :  { %440 = vmatmul.mubr.msk.f32.gmra.mrb[6].mxu1 %vm201_vm1, %v176_v59 }
 0x1ca   :  { %v280_v60 = vpop.f32.mrb[0].mxu1 }
 0x1cb   :  { %v282_v61 = vpop.f32.mrb[1].mxu1  ;;  %v281_v63 = vadd.f32 %v280_v60, %v184_v62 }
 0x1cc   :  { %v283_v1 = vadd.f32 %v282_v61, %v184_v62 }
 0x1cd   :  { %v303_v7 = vmax.f32 %v281_v63, 0.0 }
 0x1ce   :  { %v286_v2 = vpop.f32.mrb[2].mxu1  ;;  %v304_v9 = vmax.f32 %v283_v1, 0.0 }
 0x1cf   :  { %v287_v3 = vadd.f32 %v286_v2, %v189_v0  ;;  %v288_v4 = vpop.f32.mrb[3].mxu1 }
 0x1d0   :  { %v289_v5 = vadd.f32 %v288_v4, %v189_v0 }
 0x1d1   :  { %v305_v8 = vmax.f32 %v287_v3, 0.0 }
 0x1d2   :  { %v306_v6 = vmax.f32 %v289_v5, 0.0  ;;  %v292_v10 = vpop.f32.mrb[4].mxu1 }
 0x1d3   :  { %v456_v11 = vpack.c.bf16 %v305_v8, %v303_v7  ;;  %v294_v12 = vpop.f32.mrb[5].mxu1  ;;  %v293_v15 = vadd.f32 %v292_v10, %v194_v13 }
 0x1d4   :  { %v454_v14 = vpack.c.bf16 %v306_v6, %v304_v9  ;;  %v295_v17 = vadd.f32 %v294_v12, %v194_v13 }
 0x1d5   :  { %v307_v22 = vmax.f32 %v293_v15, 0.0 }
 0x1d6   :  { %v298_v18 = vpop.f32.mrb[6].mxu1  ;;  %455 = vmatprep.subr.bf16.mxu0 %v454_v14  ;;  %v308_v24 = vmax.f32 %v295_v17, 0.0 }
 0x1d7   :  { %v299_v19 = vadd.f32 %v298_v18, %v199_v16  ;;  %v300_v20 = vpop.f32.mrb[7].mxu1  ;;  %457 = vmatpush1.bf16.msra.mxu0 %v456_v11 }
 0x1d8   :  { %v301_v21 = vadd.f32 %v300_v20, %v199_v16 }
 0x1d9   :  { %v309_v23 = vmax.f32 %v299_v19, 0.0 }
 0x1da   :  { %v310_v25 = vmax.f32 %v301_v21, 0.0 }
 0x1db   :  { %v460_v26 = vpack.c.bf16 %v309_v23, %v307_v22 }
 0x1dc   :  { %v458_v27 = vpack.c.bf16 %v310_v25, %v308_v24 }
 0x1de   :  { %459 = vmatprep.subr.bf16.mxu0 %v458_v27 }
 0x1df   :  { %461 = vmatpush1.bf16.msra.mxu0 %v460_v26 }
 0x1e2   :  { %441 = vmatmul.mubr.msk.f32.vlgmr.msra.gmra.mrb[8].mxu0 %vm201_vm1, %v311_v28 }
 0x2b5   :  { %v391_v37 = vpop.f32.mrb[8].mxu0 }
 0x2b6   :  { %v392_v38 = vadd.f32 %v391_v37, %v321_v36  ;;  %v393_v39 = vpop.f32.mrb[9].mxu0 }
 0x2b7   :  { %v394_v40 = vadd.f32 %v393_v39, %v321_v36 }
 0x2b9   :  { %v398_v42 = vcombine.low %v392_v38, %v394_v40 }
 0x2bb   :  { %v405_v43 = vrot.slane %v398_v42, %v404_v41 }
 0x2bd   :  { %v412_v44 = vrot.slane %v405_v43, %v404_v41 }
 0x2bf   :  { %418 = vst.msk [vmem:[#allocation3] sm:$0x3] %vm416_vm2, %v412_v44 }
 0x2c0   :  { %479 = shalt.err (!%p476_p4)
}
 0x2c1   :  { %s480_s23 = scalar_lea.hbm %s645_s7, 32 }
 0x2c2   :  { %p481_p5 = scmp.ne.s32.totalorder %s645_s7, %s480_s23  ;;  %p484_p6 = scmp.lt.u32.totalorder %s480_s23, %s645_s7 }
 0x2c4   :  { %p486_p7 = pnand %p484_p6, %p481_p5 }
 0x2c6   :  { %489 = shalt.err (!%p486_p7)
}
 0x2c7   :  { %428 = dma.vmem_to_hbm [thread:$0]  %s426_s20, 32, %s645_s7, [#allocation4]  }
 0x2c8   :  { %490 = dma.done.wait [#allocation4], 32  }
 0x2c9   :  { %491 = vsyncadd [#allocation4], 4294967264 }
 0x2ca   :  { %432 = vsyncpa [#allocation4], 1 }

</bundles_post_ra>
